<compile_context>
chip_gen: v7x
topology: tpu7x:2x2x1
jax: 0.10.0
libtpu: 0.0.40
codegen_flags: <defaults>
</compile_context>

<pallas_src>
import functools
import math

import jax
import jax.numpy as jnp
from jax.experimental import pallas as pl
from jax.experimental.pallas import tpu as pltpu


# ----------------------------- device heuristics ----------------------------

def _vmem_limit_bytes():
    """Best-effort scoped-VMEM budget: ~80% of physical, capped at 100 MiB."""
    try:
        cap = int(pltpu.get_tpu_info().vmem_capacity_bytes)
        return int(min(100 * 1024 * 1024, 0.8 * cap))
    except Exception:
        return 48 * 1024 * 1024


def _exp_dtype():
    """bf16 exp on chips with a bf16 EUP (v6e/v7x); f32 elsewhere (v5e & older)."""
    try:
        kind = jax.devices()[0].device_kind.lower()
    except Exception:
        return jnp.float32
    return jnp.bfloat16 if ("v6" in kind or "v7" in kind) else jnp.float32


def _row_tile(rows, vmem_budget):
    """Bigger row tiles when VMEM allows (v5e/v6e); conservative on v7x."""
    target = 512 if vmem_budget >= 80 * 1024 * 1024 else 256
    return rows if rows <= target else target


def _seq_tile(seq_len, target=256):
    """Sequence tile for flash attention: divides L, multiple of 8 when possible."""
    if seq_len <= target:
        return seq_len
    for t in (256, 128, 64, 32, 16, 8):
        if t <= target and seq_len % t == 0:
            return t
    return seq_len


def _heads_per_col_tile(three_h, head_dim, target_cols=1536):
    """# of head-slabs per QKV-projection output tile (divisor of 3H)."""
    for d in range(three_h, 0, -1):
        if three_h % d == 0 and d * head_dim <= target_cols:
            return d
    return 1


def _layer_norm(y, gamma, beta, eps=1e-5):
    # f32 math, matches torch.nn.LayerNorm(eps=1e-5)
    mu = jnp.mean(y, axis=-1, keepdims=True)
    var = jnp.mean((y - mu) ** 2, axis=-1, keepdims=True)
    return (y - mu) * jax.lax.rsqrt(var + eps) * gamma + beta


# ----------------------------- Pallas kernels ------------------------------

def _qkv_proj_kernel(x_ref, w_ref, b_ref, o_ref, *, head_dim):
    # x: (TM, E) f32, w: (E, TN) bf16, b: (1, TN) f32 -> o: (slabs, TM, hd) bf16
    acc = jnp.dot(x_ref[...].astype(jnp.bfloat16), w_ref[...],
                  preferred_element_type=jnp.float32) + b_ref[...]
    acc = acc.astype(o_ref.dtype)                          # (TM, TN)
    n_slabs = o_ref.shape[0]
    for j in range(n_slabs):                               # head-major scatter
        o_ref[j] = acc[:, j * head_dim:(j + 1) * head_dim]


def _flash_mha_kernel(q_ref, k_ref, v_ref, o_ref, m_sc, l_sc, acc_sc, *, exp_dtype):
    # One (batch, head, q-tile) triple, iterating over k-tiles (online softmax).
    # q/k/v blocks: (1, TQ|TK, hd) bf16; q is already scaled by 1/sqrt(hd).
    ki = pl.program_id(3)

    @pl.when(ki == 0)
    def _():
        m_sc[...] = jnp.full(m_sc.shape, -jnp.inf, m_sc.dtype)
        l_sc[...] = jnp.zeros(l_sc.shape, l_sc.dtype)
        acc_sc[...] = jnp.zeros(acc_sc.shape, acc_sc.dtype)

    q = q_ref[0]                                           # (TQ, hd) bf16
    k = k_ref[0]                                           # (TK, hd) bf16
    v = v_ref[0]                                           # (TK, hd) bf16

    s = jax.lax.dot_general(                               # (TQ, TK) f32, MXU
        q, k, dimension_numbers=(((1,), (1,)), ((), ())),
        preferred_element_type=jnp.float32)

    m_prev = m_sc[...]
    m_new = jnp.maximum(m_prev, jnp.max(s, axis=-1, keepdims=True))
    alpha = jnp.exp(m_prev - m_new)                        # (TQ, 1) f32
    p = jnp.exp((s - m_new).astype(exp_dtype))             # bf16 EUP on v6e/v7x
    l_sc[...] = alpha * l_sc[...] + jnp.sum(p.astype(jnp.float32),
                                            axis=-1, keepdims=True)
    acc_sc[...] = alpha * acc_sc[...] + jnp.dot(
        p.astype(jnp.bfloat16), v, preferred_element_type=jnp.float32)
    m_sc[...] = m_new

    @pl.when(ki == pl.num_programs(3) - 1)
    def _():
        o_ref[0] = (acc_sc[...] *
                    pl.reciprocal(l_sc[...], approx=True)).astype(o_ref.dtype)


def _block_tail_kernel(x_ref, a_ref, wo_ref, bo_ref, g1_ref, bt1_ref,
                       w1_ref, bf1_ref, w2_ref, bf2_ref, g2_ref, bt2_ref,
                       o_ref, *, n_heads):
    # Fused: out_proj (head-major sum) + residual + LN1 + FFN + residual + LN2
    # on one row tile; the intermediate `y` never round-trips HBM.
    x = x_ref[...]                                         # (TM, E) f32 residual
    proj = jnp.dot(a_ref[0], wo_ref[0], preferred_element_type=jnp.float32)
    for h in range(1, n_heads):
        proj = proj + jnp.dot(a_ref[h], wo_ref[h],
                              preferred_element_type=jnp.float32)
    proj = proj + bo_ref[...]
    y = _layer_norm(x + proj, g1_ref[...], bt1_ref[...])   # (TM, E) f32
    hdn = jnp.maximum(
        jnp.dot(y.astype(jnp.bfloat16), w1_ref[...],
                preferred_element_type=jnp.float32) + bf1_ref[...],
        0.0)                                               # (TM, Hf) f32
    ffn = jnp.dot(hdn.astype(jnp.bfloat16), w2_ref[...],
                  preferred_element_type=jnp.float32) + bf2_ref[...]
    o_ref[...] = _layer_norm(y + ffn, g2_ref[...], bt2_ref[...]).astype(o_ref.dtype)


# ------------------------------ Python wrapper ------------------------------

def transformer_block(x, params, *, n_heads):
    """x: (L, N, E) float32; returns (L, N, E) float32. Eval-mode forward."""
    L, N, E = x.shape
    H = n_heads
    hd = E // H
    assert hd * H == E
    Hf = params["w_ffn1"].shape[1]
    rows = N * L

    vmem_budget = _vmem_limit_bytes()
    exp_dtype = _exp_dtype()

    TM = _row_tile(rows, vmem_budget)
    n_row_tiles = pl.cdiv(rows, TM)
    TQ = _seq_tile(L)
    TK = _seq_tile(L)
    nq, nk = L // TQ, L // TK
    slabs = _heads_per_col_tile(3 * H, hd)
    TN = slabs * hd
    n_col_groups = (3 * H) // slabs

    # Fold the 1/sqrt(hd) softmax scale into the Q third of the projection.
    inv_scale = 1.0 / math.sqrt(hd)
    col_scale = jnp.concatenate(
        [jnp.full((E,), inv_scale, jnp.float32), jnp.ones((2 * E,), jnp.float32)])
    w_in = (params["w_in"] * col_scale[None, :]).astype(jnp.bfloat16)
    b_in = params["b_in"] * col_scale[None, :]             # stays f32

    # Other weights: cast once for the MXU; biases / LN params stay f32.
    w_out_hm = params["w_out"].astype(jnp.bfloat16).reshape(H, hd, E)
    w_ffn1 = params["w_ffn1"].astype(jnp.bfloat16)
    w_ffn2 = params["w_ffn2"].astype(jnp.bfloat16)

    # Batch-major activations (N*L, E); one transpose in, one out.
    xb2d = x.transpose(1, 0, 2).reshape(rows, E)

    row_params = pltpu.CompilerParams(
        dimension_semantics=("parallel",), vmem_limit_bytes=vmem_budget)

    # --- 1) fused QKV projection -> head-major (3H, rows, hd) bf16 ---
    qkv_hm = pl.pallas_call(
        functools.partial(_qkv_proj_kernel, head_dim=hd),
        grid=(n_row_tiles, n_col_groups),
        in_specs=[
            pl.BlockSpec((TM, E), lambda i, j: (i, 0)),     # x resident over j
            pl.BlockSpec((E, TN), lambda i, j: (0, j)),     # w_in column group
            pl.BlockSpec((1, TN), lambda i, j: (0, j)),     # b_in column group
        ],
        out_specs=pl.BlockSpec((slabs, TM, hd), lambda i, j: (j, i, 0)),
        out_shape=jax.ShapeDtypeStruct((3 * H, rows, hd), jnp.bfloat16),
        compiler_params=pltpu.CompilerParams(
            dimension_semantics=("parallel", "parallel"),
            vmem_limit_bytes=vmem_budget),
        cost_estimate=pl.CostEstimate(
            flops=int(2 * rows * E * 3 * E),
            transcendentals=0,
            bytes_accessed=int(rows * E * 4 + E * 3 * E * 2
                               + 3 * E * 4 + rows * 3 * E * 2)),
    )(xb2d, w_in, b_in)

    # --- 2) flash-style multi-head attention, grid (N, H, q-tiles, k-tiles) ---
    attn_hm = pl.pallas_call(
        functools.partial(_flash_mha_kernel, exp_dtype=exp_dtype),
        grid=(N, H, nq, nk),
        in_specs=[
            pl.BlockSpec((1, TQ, hd), lambda b, h, qi, ki: (h, b * nq + qi, 0)),
            pl.BlockSpec((1, TK, hd), lambda b, h, qi, ki: (H + h, b * nk + ki, 0)),
            pl.BlockSpec((1, TK, hd), lambda b, h, qi, ki: (2 * H + h, b * nk + ki, 0)),
        ],
        out_specs=pl.BlockSpec((1, TQ, hd), lambda b, h, qi, ki: (h, b * nq + qi, 0)),
        out_shape=jax.ShapeDtypeStruct((H, rows, hd), jnp.bfloat16),
        scratch_shapes=[
            pltpu.VMEM((TQ, 1), jnp.float32),    # running max
            pltpu.VMEM((TQ, 1), jnp.float32),    # running denom
            pltpu.VMEM((TQ, hd), jnp.float32),   # output accumulator
        ],
        compiler_params=pltpu.CompilerParams(
            dimension_semantics=("parallel", "parallel", "parallel", "arbitrary"),
            vmem_limit_bytes=vmem_budget),
        cost_estimate=pl.CostEstimate(
            flops=int(4 * N * L * L * E),
            transcendentals=int(N * H * L * L),
            bytes_accessed=int(N * L * 3 * E * 2 * nk + N * L * E * 2)),
    )(qkv_hm, qkv_hm, qkv_hm)

    # --- 3) out_proj + residual/LN1 + FFN + residual/LN2, fused & row-tiled ---
    z2d = pl.pallas_call(
        functools.partial(_block_tail_kernel, n_heads=H),
        grid=(n_row_tiles,),
        in_specs=[
            pl.BlockSpec((TM, E), lambda i: (i, 0)),        # residual x (f32)
            pl.BlockSpec((H, TM, hd), lambda i: (0, i, 0)),  # attention (head-major)
            pl.BlockSpec((H, hd, E), lambda i: (0, 0, 0)),   # w_out (head-major bf16)
            pl.BlockSpec((1, E), lambda i: (0, 0)),          # b_out
            pl.BlockSpec((1, E), lambda i: (0, 0)),          # ln1 gamma
            pl.BlockSpec((1, E), lambda i: (0, 0)),          # ln1 beta
            pl.BlockSpec((E, Hf), lambda i: (0, 0)),         # w_ffn1 (bf16)
            pl.BlockSpec((1, Hf), lambda i: (0, 0)),         # b_ffn1
            pl.BlockSpec((Hf, E), lambda i: (0, 0)),         # w_ffn2 (bf16)
            pl.BlockSpec((1, E), lambda i: (0, 0)),          # b_ffn2
            pl.BlockSpec((1, E), lambda i: (0, 0)),          # ln2 gamma
            pl.BlockSpec((1, E), lambda i: (0, 0)),          # ln2 beta
        ],
        out_specs=pl.BlockSpec((TM, E), lambda i: (i, 0)),
        out_shape=jax.ShapeDtypeStruct((rows, E), jnp.float32),
        compiler_params=row_params,
        cost_estimate=pl.CostEstimate(
            flops=int(2 * rows * (E * E + 2 * E * Hf)),
            transcendentals=0,
            bytes_accessed=int(rows * E * (4 + 2 + 4) + (E * E + 2 * E * Hf) * 2)),
    )(xb2d, attn_hm, w_out_hm, params["b_out"],
      params["ln1_g"], params["ln1_b"],
      w_ffn1, params["b_ffn1"], w_ffn2, params["b_ffn2"],
      params["ln2_g"], params["ln2_b"])

    return z2d.reshape(N, L, E).transpose(1, 0, 2)          # back to (L, N, E)


# ------------------------------- Param setup --------------------------------

def make_params(key, d_model, n_heads, ffn_hidden):
    E, H_ffn = d_model, ffn_hidden
    ks = jax.random.split(key, 8)
    # Weights stored already transposed so kernels do plain x @ W.
    # PyTorch layouts: in_proj_weight (3E, E); out_proj.weight (E, E);
    # linear1.weight (H, E); linear2.weight (E, H). We keep W = weight.T.
    scale = 0.05
    return {
        "w_in":   scale * jax.random.normal(ks[0], (E, 3 * E), jnp.float32),
        "b_in":   scale * jax.random.normal(ks[1], (1, 3 * E), jnp.float32),
        "w_out":  scale * jax.random.normal(ks[2], (E, E), jnp.float32),
        "b_out":  scale * jax.random.normal(ks[3], (1, E), jnp.float32),
        "w_ffn1": scale * jax.random.normal(ks[4], (E, H_ffn), jnp.float32),
        "b_ffn1": scale * jax.random.normal(ks[5], (1, H_ffn), jnp.float32),
        "w_ffn2": scale * jax.random.normal(ks[6], (H_ffn, E), jnp.float32),
        "b_ffn2": scale * jax.random.normal(ks[7], (1, E), jnp.float32),
        "ln1_g":  jnp.ones((1, E), jnp.float32),
        "ln1_b":  jnp.zeros((1, E), jnp.float32),
        "ln2_g":  jnp.ones((1, E), jnp.float32),
        "ln2_b":  jnp.zeros((1, E), jnp.float32),
    }


if __name__ == "__main__":
    # Small, module-consistent shapes.
    L, N = 8, 2                        # seq_len, batch
    d_model, n_heads, ffn_hidden = 32, 4, 64

    key = jax.random.PRNGKey(0)
    k_x, k_p = jax.random.split(key)
    x = jax.random.normal(k_x, (L, N, d_model), jnp.float32)   # layout: (L, N, E)
    params = make_params(k_p, d_model, n_heads, ffn_hidden)

    out = transformer_block(x, params, n_heads=n_heads)
    out = jax.block_until_ready(out)
    assert out.shape == (L, N, d_model)
    assert jnp.all(jnp.isfinite(out))
    print("KERNEL_OK")
</pallas_src>

<mosaic_0001>
module attributes {stable_mosaic.version = 11 : i64} {
  func.func @_qkv_proj_kernel(%arg0: i32, %arg1: i32, %arg2: memref<16x32xf32, #tpu.memory_space<vmem>>, %arg3: memref<32x96xbf16, #tpu.memory_space<vmem>>, %arg4: memref<1x96xf32, #tpu.memory_space<vmem>>, %arg5: memref<12x16x8xbf16, #tpu.memory_space<vmem>>) attributes {dimension_semantics = [#tpu.dimension_semantics<parallel>, #tpu.dimension_semantics<parallel>], iteration_bounds = array<i64: 1, 1>, scalar_prefetch = 0 : i64, scratch_operands = 0 : i64, tpu.core_type = #tpu.core_type<tc>, window_params = [{transform_indices = @transform_0, window_bounds = array<i64: 16, 32>}, {transform_indices = @transform_1, window_bounds = array<i64: 32, 96>}, {transform_indices = @transform_2, window_bounds = array<i64: 1, 96>}, {transform_indices = @transform_3, window_bounds = array<i64: 12, 16, 8>}]} {
    %c0 = arith.constant 0 : index
    %c0_0 = arith.constant 0 : index
    %0 = vector.load %arg2[%c0, %c0_0] : memref<16x32xf32, #tpu.memory_space<vmem>>, vector<16x32xf32>
    %1 = arith.truncf %0 : vector<16x32xf32> to vector<16x32xbf16>
    %c0_1 = arith.constant 0 : index
    %c0_2 = arith.constant 0 : index
    %2 = vector.load %arg3[%c0_1, %c0_2] : memref<32x96xbf16, #tpu.memory_space<vmem>>, vector<32x96xbf16>
    %cst = arith.constant dense<0.000000e+00> : vector<16x96xf32>
    %3 = tpu.matmul %1, %2, %cst {dimension_numbers = #tpu.dot_dimension_numbers<[1], [0], [0], [1], [0, 0, 1, 1], [], []>} : vector<16x32xbf16>, vector<32x96xbf16>, vector<16x96xf32> -> vector<16x96xf32>
    %c0_3 = arith.constant 0 : index
    %c0_4 = arith.constant 0 : index
    %4 = vector.load %arg4[%c0_3, %c0_4] : memref<1x96xf32, #tpu.memory_space<vmem>>, vector<1x96xf32>
    %5 = vector.broadcast %4 : vector<1x96xf32> to vector<16x96xf32>
    %6 = arith.addf %3, %5 : vector<16x96xf32>
    %7 = arith.truncf %6 : vector<16x96xf32> to vector<16x96xbf16>
    %8 = vector.extract_strided_slice %7 {offsets = [0, 0], sizes = [16, 8], strides = [1, 1]} : vector<16x96xbf16> to vector<16x8xbf16>
    %c0_5 = arith.constant 0 : index
    %c0_6 = arith.constant 0 : index
    %c0_7 = arith.constant 0 : index
    %9 = vector.load %arg5[%c0_5, %c0_6, %c0_7] : memref<12x16x8xbf16, #tpu.memory_space<vmem>>, vector<1x16x8xbf16>
    %10 = vector.shape_cast %9 : vector<1x16x8xbf16> to vector<16x8xbf16>
    %11 = vector.shape_cast %8 : vector<16x8xbf16> to vector<1x16x8xbf16>
    tpu.vector_store %arg5[%c0_5, %c0_6, %c0_7], %11 {strides = array<i32>} : memref<12x16x8xbf16, #tpu.memory_space<vmem>>, vector<1x16x8xbf16>,
    %12 = vector.extract_strided_slice %7 {offsets = [0, 8], sizes = [16, 8], strides = [1, 1]} : vector<16x96xbf16> to vector<16x8xbf16>
    %c1 = arith.constant 1 : index
    %c0_8 = arith.constant 0 : index
    %c0_9 = arith.constant 0 : index
    %13 = vector.load %arg5[%c1, %c0_8, %c0_9] : memref<12x16x8xbf16, #tpu.memory_space<vmem>>, vector<1x16x8xbf16>
    %14 = vector.shape_cast %13 : vector<1x16x8xbf16> to vector<16x8xbf16>
    %15 = vector.shape_cast %12 : vector<16x8xbf16> to vector<1x16x8xbf16>
    tpu.vector_store %arg5[%c1, %c0_8, %c0_9], %15 {strides = array<i32>} : memref<12x16x8xbf16, #tpu.memory_space<vmem>>, vector<1x16x8xbf16>,
    %16 = vector.extract_strided_slice %7 {offsets = [0, 16], sizes = [16, 8], strides = [1, 1]} : vector<16x96xbf16> to vector<16x8xbf16>
    %c2 = arith.constant 2 : index
    %c0_10 = arith.constant 0 : index
    %c0_11 = arith.constant 0 : index
    %17 = vector.load %arg5[%c2, %c0_10, %c0_11] : memref<12x16x8xbf16, #tpu.memory_space<vmem>>, vector<1x16x8xbf16>
    %18 = vector.shape_cast %17 : vector<1x16x8xbf16> to vector<16x8xbf16>
    %19 = vector.shape_cast %16 : vector<16x8xbf16> to vector<1x16x8xbf16>
    tpu.vector_store %arg5[%c2, %c0_10, %c0_11], %19 {strides = array<i32>} : memref<12x16x8xbf16, #tpu.memory_space<vmem>>, vector<1x16x8xbf16>,
    %20 = vector.extract_strided_slice %7 {offsets = [0, 24], sizes = [16, 8], strides = [1, 1]} : vector<16x96xbf16> to vector<16x8xbf16>
    %c3 = arith.constant 3 : index
    %c0_12 = arith.constant 0 : index
    %c0_13 = arith.constant 0 : index
    %21 = vector.load %arg5[%c3, %c0_12, %c0_13] : memref<12x16x8xbf16, #tpu.memory_space<vmem>>, vector<1x16x8xbf16>
    %22 = vector.shape_cast %21 : vector<1x16x8xbf16> to vector<16x8xbf16>
    %23 = vector.shape_cast %20 : vector<16x8xbf16> to vector<1x16x8xbf16>
    tpu.vector_store %arg5[%c3, %c0_12, %c0_13], %23 {strides = array<i32>} : memref<12x16x8xbf16, #tpu.memory_space<vmem>>, vector<1x16x8xbf16>,
    %24 = vector.extract_strided_slice %7 {offsets = [0, 32], sizes = [16, 8], strides = [1, 1]} : vector<16x96xbf16> to vector<16x8xbf16>
    %c4 = arith.constant 4 : index
    %c0_14 = arith.constant 0 : index
    %c0_15 = arith.constant 0 : index
    %25 = vector.load %arg5[%c4, %c0_14, %c0_15] : memref<12x16x8xbf16, #tpu.memory_space<vmem>>, vector<1x16x8xbf16>
    %26 = vector.shape_cast %25 : vector<1x16x8xbf16> to vector<16x8xbf16>
    %27 = vector.shape_cast %24 : vector<16x8xbf16> to vector<1x16x8xbf16>
    tpu.vector_store %arg5[%c4, %c0_14, %c0_15], %27 {strides = array<i32>} : memref<12x16x8xbf16, #tpu.memory_space<vmem>>, vector<1x16x8xbf16>,
    %28 = vector.extract_strided_slice %7 {offsets = [0, 40], sizes = [16, 8], strides = [1, 1]} : vector<16x96xbf16> to vector<16x8xbf16>
    %c5 = arith.constant 5 : index
    %c0_16 = arith.constant 0 : index
    %c0_17 = arith.constant 0 : index
    %29 = vector.load %arg5[%c5, %c0_16, %c0_17] : memref<12x16x8xbf16, #tpu.memory_space<vmem>>, vector<1x16x8xbf16>
    %30 = vector.shape_cast %29 : vector<1x16x8xbf16> to vector<16x8xbf16>
    %31 = vector.shape_cast %28 : vector<16x8xbf16> to vector<1x16x8xbf16>
    tpu.vector_store %arg5[%c5, %c0_16, %c0_17], %31 {strides = array<i32>} : memref<12x16x8xbf16, #tpu.memory_space<vmem>>, vector<1x16x8xbf16>,
    %32 = vector.extract_strided_slice %7 {offsets = [0, 48], sizes = [16, 8], strides = [1, 1]} : vector<16x96xbf16> to vector<16x8xbf16>
    %c6 = arith.constant 6 : index
    %c0_18 = arith.constant 0 : index
    %c0_19 = arith.constant 0 : index
    %33 = vector.load %arg5[%c6, %c0_18, %c0_19] : memref<12x16x8xbf16, #tpu.memory_space<vmem>>, vector<1x16x8xbf16>
    %34 = vector.shape_cast %33 : vector<1x16x8xbf16> to vector<16x8xbf16>
    %35 = vector.shape_cast %32 : vector<16x8xbf16> to vector<1x16x8xbf16>
    tpu.vector_store %arg5[%c6, %c0_18, %c0_19], %35 {strides = array<i32>} : memref<12x16x8xbf16, #tpu.memory_space<vmem>>, vector<1x16x8xbf16>,
    %36 = vector.extract_strided_slice %7 {offsets = [0, 56], sizes = [16, 8], strides = [1, 1]} : vector<16x96xbf16> to vector<16x8xbf16>
    %c7 = arith.constant 7 : index
    %c0_20 = arith.constant 0 : index
    %c0_21 = arith.constant 0 : index
    %37 = vector.load %arg5[%c7, %c0_20, %c0_21] : memref<12x16x8xbf16, #tpu.memory_space<vmem>>, vector<1x16x8xbf16>
    %38 = vector.shape_cast %37 : vector<1x16x8xbf16> to vector<16x8xbf16>
    %39 = vector.shape_cast %36 : vector<16x8xbf16> to vector<1x16x8xbf16>
    tpu.vector_store %arg5[%c7, %c0_20, %c0_21], %39 {strides = array<i32>} : memref<12x16x8xbf16, #tpu.memory_space<vmem>>, vector<1x16x8xbf16>,
    %40 = vector.extract_strided_slice %7 {offsets = [0, 64], sizes = [16, 8], strides = [1, 1]} : vector<16x96xbf16> to vector<16x8xbf16>
    %c8 = arith.constant 8 : index
    %c0_22 = arith.constant 0 : index
    %c0_23 = arith.constant 0 : index
    %41 = vector.load %arg5[%c8, %c0_22, %c0_23] : memref<12x16x8xbf16, #tpu.memory_space<vmem>>, vector<1x16x8xbf16>
    %42 = vector.shape_cast %41 : vector<1x16x8xbf16> to vector<16x8xbf16>
    %43 = vector.shape_cast %40 : vector<16x8xbf16> to vector<1x16x8xbf16>
    tpu.vector_store %arg5[%c8, %c0_22, %c0_23], %43 {strides = array<i32>} : memref<12x16x8xbf16, #tpu.memory_space<vmem>>, vector<1x16x8xbf16>,
    %44 = vector.extract_strided_slice %7 {offsets = [0, 72], sizes = [16, 8], strides = [1, 1]} : vector<16x96xbf16> to vector<16x8xbf16>
    %c9 = arith.constant 9 : index
    %c0_24 = arith.constant 0 : index
    %c0_25 = arith.constant 0 : index
    %45 = vector.load %arg5[%c9, %c0_24, %c0_25] : memref<12x16x8xbf16, #tpu.memory_space<vmem>>, vector<1x16x8xbf16>
    %46 = vector.shape_cast %45 : vector<1x16x8xbf16> to vector<16x8xbf16>
    %47 = vector.shape_cast %44 : vector<16x8xbf16> to vector<1x16x8xbf16>
    tpu.vector_store %arg5[%c9, %c0_24, %c0_25], %47 {strides = array<i32>} : memref<12x16x8xbf16, #tpu.memory_space<vmem>>, vector<1x16x8xbf16>,
    %48 = vector.extract_strided_slice %7 {offsets = [0, 80], sizes = [16, 8], strides = [1, 1]} : vector<16x96xbf16> to vector<16x8xbf16>
    %c10 = arith.constant 10 : index
    %c0_26 = arith.constant 0 : index
    %c0_27 = arith.constant 0 : index
    %49 = vector.load %arg5[%c10, %c0_26, %c0_27] : memref<12x16x8xbf16, #tpu.memory_space<vmem>>, vector<1x16x8xbf16>
    %50 = vector.shape_cast %49 : vector<1x16x8xbf16> to vector<16x8xbf16>
    %51 = vector.shape_cast %48 : vector<16x8xbf16> to vector<1x16x8xbf16>
    tpu.vector_store %arg5[%c10, %c0_26, %c0_27], %51 {strides = array<i32>} : memref<12x16x8xbf16, #tpu.memory_space<vmem>>, vector<1x16x8xbf16>,
    %52 = vector.extract_strided_slice %7 {offsets = [0, 88], sizes = [16, 8], strides = [1, 1]} : vector<16x96xbf16> to vector<16x8xbf16>
    %c11 = arith.constant 11 : index
    %c0_28 = arith.constant 0 : index
    %c0_29 = arith.constant 0 : index
    %53 = vector.load %arg5[%c11, %c0_28, %c0_29] : memref<12x16x8xbf16, #tpu.memory_space<vmem>>, vector<1x16x8xbf16>
    %54 = vector.shape_cast %53 : vector<1x16x8xbf16> to vector<16x8xbf16>
    %55 = vector.shape_cast %52 : vector<16x8xbf16> to vector<1x16x8xbf16>
    tpu.vector_store %arg5[%c11, %c0_28, %c0_29], %55 {strides = array<i32>} : memref<12x16x8xbf16, #tpu.memory_space<vmem>>, vector<1x16x8xbf16>,
    return
  }
  func.func @transform_0(%arg0: i32, %arg1: i32) -> (i32, i32) {
    %c0_i32 = arith.constant 0 : i32
    %c0_i32_0 = arith.constant 0 : i32
    return %arg0, %c0_i32 : i32, i32
  }
  func.func @transform_1(%arg0: i32, %arg1: i32) -> (i32, i32) {
    %c0_i32 = arith.constant 0 : i32
    %c0_i32_0 = arith.constant 0 : i32
    return %c0_i32, %arg1 : i32, i32
  }
  func.func @transform_2(%arg0: i32, %arg1: i32) -> (i32, i32) {
    %c0_i32 = arith.constant 0 : i32
    %c0_i32_0 = arith.constant 0 : i32
    return %c0_i32, %arg1 : i32, i32
  }
  func.func @transform_3(%arg0: i32, %arg1: i32) -> (i32, i32, i32) {
    %c0_i32 = arith.constant 0 : i32
    %c0_i32_0 = arith.constant 0 : i32
    return %arg1, %arg0, %c0_i32 : i32, i32, i32
  }
}

</mosaic_0001>

<bundles_post_ra>
// kernel: tpu_custom_call.1
= control target key start
LH: loop header
LB: loop body
LE: loop exit
PB: predicated region body
PF: predicated region fallthrough
CT: control target
= control target key end

     0   :  { %8 = vsyncpa [#allocation3], 0  ;;  %s504_s0 = inlined_call_operand.hbm [shape: f32[16,32], index: 0, kind: input, shape index: {}]   ;;  %s505_s1 = inlined_call_operand.hbm [shape: bf16[32,96], index: 1, kind: input, shape index: {}]   ;;  %s506_s2 = inlined_call_operand.vmem [shape: f32[1,96], index: 2, kind: input, shape index: {}]   ;;  %s507_s3 = inlined_call_operand.vmem [shape: bf16[12,16,8], index: 3, kind: output, shape index: {}]  }
   0x1   :  { %9 = vsyncpa [#allocation5], 0  ;;  %s339_s12 = smov [#allocation2]   ;;  %s291_s16 = scalar_lea.hbm %s504_s0, 256 }
   0x2   :  { %s15_s13 = sshll.u32 %s339_s12, 4  ;;  %p292_p0 = scmp.ne.s32.totalorder %s504_s0, %s291_s16  ;;  %s16_s13 = int_to_ptr.vmem [resolvable:$true] %s15_s13 }
   0x3   :  { %p295_p1 = scmp.lt.u32.totalorder %s291_s16, %s504_s0 }
   0x5   :  { %p297_p2 = pnand %p295_p1, %p292_p0 }
   0x7   :  { %300 = shalt.err (!%p297_p2)
}
   0x8   :  { %s301_s21 = scalar_lea.vmem %s16_s13, 256  ;;  %p306_p4 = scmp.lt.s32.totalorder %s16_s13, %s16_s13 }
   0x9   :  { %p302_p3 = scmp.ne.s32.totalorder %s16_s13, %s301_s21  ;;  %p307_p5 = scmp.lt.s32.totalorder %s301_s21, %s301_s21 }
   0xb   :  { %p308_p6 = por %p307_p5, %p306_p4 }
   0xd   :  { %p309_p7 = pnand %p308_p6, %p302_p3 }
   0xf   :  { %312 = shalt.err (!%p309_p7)
}
  0x10   :  { %s340_s22 = smov 128   ;;  %s341_s23 = smov 8  }
  0x11   :  { %21 = dma.hbm_to_vmem [thread:$0]  %s504_s0, 256, %s16_s13, [#allocation3], %s340_s22, %s340_s22, %s341_s23  }
  0x12   :  { %s342_s26 = smov [#allocation4]   ;;  %s313_s30 = scalar_lea.hbm %s505_s1, 256 }
  0x13   :  { %s27_s27 = sshll.u32 %s342_s26, 4  ;;  %p314_p8 = scmp.ne.s32.totalorder %s505_s1, %s313_s30  ;;  %s28_s27 = int_to_ptr.vmem [resolvable:$true] %s27_s27 }
  0x14   :  { %p317_p9 = scmp.lt.u32.totalorder %s313_s30, %s505_s1 }
  0x16   :  { %p319_p10 = pnand %p317_p9, %p314_p8 }
  0x18   :  { %322 = shalt.err (!%p319_p10)
}
  0x19   :  { %s323_s8 = scalar_lea.vmem %s28_s27, 256  ;;  %p328_p12 = scmp.lt.s32.totalorder %s28_s27, %s28_s27 }
  0x1a   :  { %p324_p11 = scmp.ne.s32.totalorder %s28_s27, %s323_s8  ;;  %p329_p13 = scmp.lt.s32.totalorder %s323_s8, %s323_s8 }
  0x1c   :  { %p330_p0 = por %p329_p13, %p328_p12 }
  0x1e   :  { %p331_p1 = pnand %p330_p0, %p324_p11 }
  0x20   :  { %334 = shalt.err (!%p331_p1)
}
  0x21   :  { %s343_s0 = smov 64   ;;  %s344_s9 = smov 4  }
  0x22   :  { %33 = dma.hbm_to_vmem [thread:$0]  %s505_s1, 256, %s28_s27, [#allocation5], %s343_s0, %s343_s0, %s344_s9  }
  0x23   :  { %335 = dma.done.wait [#allocation3], 256  }
  0x24   :  { %336 = vsyncadd [#allocation3], 4294967040 }
  0x25   :  { %337 = dma.done.wait [#allocation5], 256  }
  0x26   :  { %338 = vsyncadd [#allocation5], 4294967040  ;;  %v345_v0 = vmov 0.0   ;;  %vm346_vm0 = vmmov 0   ;;  %v289_v1 = vld [vmem:[#allocation4] sm:$0xff]   ;;  %v290_v2 = vld [vmem:[#allocation4 + $0x8] sm:$0xff]  }
  0x27   :  { %263 = vmatprep.subr.bf16.mxu0 %v345_v0  ;;  %267 = vmatprep.mubr.msk.bf16.mxu0 %vm346_vm0, %v345_v0  ;;  %v43_v3 = vld [vmem:[#allocation2] sm:$0xff]  ;;  %v44_v4 = vld [vmem:[#allocation2 + $0x8] sm:$0xff]  ;;  %vm69_vm1 = vcmask 261120   ;;  %vm122_vm2 = vcmask 60416   ;;  %s347_s15 = smov 112   ;;  %s348_s16 = smov 120  }
  0x28   :  { %264 = vmatpush3.bf16.msra.mxu0 %v289_v1  ;;  %v45_v5 = vpack.c.bf16 %v44_v4, %v43_v3  ;;  %v230_v6 = vld [vmem:[%s506_s2] ss:$0 sm:$0xff]  ;;  %s349_s18 = smov 104   ;;  %s350_s19 = smov 96  }
  0x29   :  { %265 = vmatprep.subr.bf16.mxu0 %v345_v0  ;;  %s351_s20 = smov 88   ;;  %s352_s21 = smov 80  }
  0x2a   :  { %s353_s22 = smov 72   ;;  %s354_s23 = smov 56  }
  0x2b   :  { %s355_s24 = smov 48   ;;  %s356_s25 = smov 40  }
  0x2c   :  { %266 = vmatpush3.bf16.msra.mxu0 %v290_v2 }
  0x2f   :  { %268 = vmatmul.mubr.msk.bf16.vlgmr.msra.gmra.mrb[0].mxu0 %vm69_vm1, %v45_v5 }
 0x102   :  { %v107_v7 = vpop.f32.mrb[0].mxu0 }
 0x103   :  { %v108_v8 = vadd.f32 %v230_v6, %v107_v7  ;;  %v269_v9 = vpop.f32.mrb[1].mxu0 }
 0x104   :  { %v110_v10 = vpop.f32.mrb[2].mxu0 }
 0x105   :  { %v258_v11 = vpack.c.bf16 %v108_v8, %v108_v8  ;;  %v111_v12 = vadd.f32 %v230_v6, %v110_v10  ;;  %v270_v13 = vpop.f32.mrb[3].mxu0 }
 0x107   :  { %123 = vst.msk [vmem:[%s507_s3] sm:$0xf] %vm122_vm2, %v258_v11  ;;  %v259_v14 = vpack.c.bf16 %v111_v12, %v111_v12  ;;  %134 = vrot.lane.b32.xlu1 %v258_v11, %s347_s15  ;;  %125 = vrot.lane.b32.xlu0 %v258_v11, %s348_s16 }
 0x109   :  { %124 = vst.msk [vmem:[%s507_s3 + $0x4] sm:$0xf] %vm122_vm2, %v259_v14 }
 0x10b   :  { %143 = vrot.lane.b32.xlu0 %v258_v11, %s349_s18  ;;  %136 = vrot.lane.b32.xlu1 %v259_v14, %s347_s15 }
 0x10f   :  { %152 = vrot.lane.b32.xlu0 %v258_v11, %s350_s19  ;;  %145 = vrot.lane.b32.xlu1 %v259_v14, %s349_s18 }
 0x113   :  { %161 = vrot.lane.b32.xlu0 %v258_v11, %s351_s20  ;;  %154 = vrot.lane.b32.xlu1 %v259_v14, %s350_s19 }
 0x117   :  { %170 = vrot.lane.b32.xlu0 %v258_v11, %s352_s21  ;;  %163 = vrot.lane.b32.xlu1 %v259_v14, %s351_s20 }
 0x11b   :  { %179 = vrot.lane.b32.xlu0 %v258_v11, %s353_s22  ;;  %172 = vrot.lane.b32.xlu1 %v259_v14, %s352_s21 }
 0x11f   :  { %188 = vrot.lane.b32.xlu0 %v258_v11, %s343_s0  ;;  %181 = vrot.lane.b32.xlu1 %v259_v14, %s353_s22 }
 0x123   :  { %197 = vrot.lane.b32.xlu0 %v258_v11, %s354_s23  ;;  %190 = vrot.lane.b32.xlu1 %v259_v14, %s343_s0 }
 0x127   :  { %206 = vrot.lane.b32.xlu0 %v258_v11, %s355_s24  ;;  %199 = vrot.lane.b32.xlu1 %v259_v14, %s354_s23 }
 0x12b   :  { %208 = vrot.lane.b32.xlu1 %v259_v14, %s355_s24  ;;  %127 = vrot.lane.b32.xlu0 %v259_v14, %s348_s16 }
 0x12f   :  { %217 = vrot.lane.b32.xlu1 %v259_v14, %s356_s25  ;;  %215 = vrot.lane.b32.xlu0 %v258_v11, %s356_s25 }
 0x179   :  { %v135_v15 = vpop.permute.xlu1 %134  ;;  %v126_v16 = vpop.permute.xlu0 %125 }
 0x17a   :  { %238 = vst.msk [vmem:[%s507_s3 + $0x10] sm:$0xf] %vm122_vm2, %v135_v15  ;;  %236 = vst.msk [vmem:[%s507_s3 + $0x8] sm:$0xf] %vm122_vm2, %v126_v16 }
 0x17d   :  { %v144_v17 = vpop.permute.xlu0 %143  ;;  %v137_v18 = vpop.permute.xlu1 %136 }
 0x17e   :  { %240 = vst.msk [vmem:[%s507_s3 + $0x18] sm:$0xf] %vm122_vm2, %v144_v17  ;;  %239 = vst.msk [vmem:[%s507_s3 + $0x14] sm:$0xf] %vm122_vm2, %v137_v18 }
 0x181   :  { %v153_v19 = vpop.permute.xlu0 %152  ;;  %v146_v20 = vpop.permute.xlu1 %145 }
 0x182   :  { %242 = vst.msk [vmem:[%s507_s3 + $0x20] sm:$0xf] %vm122_vm2, %v153_v19  ;;  %241 = vst.msk [vmem:[%s507_s3 + $0x1c] sm:$0xf] %vm122_vm2, %v146_v20 }
 0x185   :  { %v162_v21 = vpop.permute.xlu0 %161  ;;  %v155_v22 = vpop.permute.xlu1 %154 }
 0x186   :  { %244 = vst.msk [vmem:[%s507_s3 + $0x28] sm:$0xf] %vm122_vm2, %v162_v21  ;;  %243 = vst.msk [vmem:[%s507_s3 + $0x24] sm:$0xf] %vm122_vm2, %v155_v22 }
 0x189   :  { %v171_v23 = vpop.permute.xlu0 %170  ;;  %v164_v24 = vpop.permute.xlu1 %163 }
 0x18a   :  { %246 = vst.msk [vmem:[%s507_s3 + $0x30] sm:$0xf] %vm122_vm2, %v171_v23  ;;  %245 = vst.msk [vmem:[%s507_s3 + $0x2c] sm:$0xf] %vm122_vm2, %v164_v24 }
 0x18d   :  { %v180_v25 = vpop.permute.xlu0 %179  ;;  %v173_v26 = vpop.permute.xlu1 %172 }
 0x18e   :  { %248 = vst.msk [vmem:[%s507_s3 + $0x38] sm:$0xf] %vm122_vm2, %v180_v25  ;;  %247 = vst.msk [vmem:[%s507_s3 + $0x34] sm:$0xf] %vm122_vm2, %v173_v26 }
 0x191   :  { %v189_v27 = vpop.permute.xlu0 %188  ;;  %v182_v28 = vpop.permute.xlu1 %181 }
 0x192   :  { %250 = vst.msk [vmem:[%s507_s3 + $0x40] sm:$0xf] %vm122_vm2, %v189_v27  ;;  %249 = vst.msk [vmem:[%s507_s3 + $0x3c] sm:$0xf] %vm122_vm2, %v182_v28 }
 0x195   :  { %v198_v29 = vpop.permute.xlu0 %197  ;;  %v191_v30 = vpop.permute.xlu1 %190 }
 0x196   :  { %252 = vst.msk [vmem:[%s507_s3 + $0x48] sm:$0xf] %vm122_vm2, %v198_v29  ;;  %251 = vst.msk [vmem:[%s507_s3 + $0x44] sm:$0xf] %vm122_vm2, %v191_v30 }
 0x199   :  { %v207_v31 = vpop.permute.xlu0 %206  ;;  %v200_v32 = vpop.permute.xlu1 %199 }
 0x19a   :  { %254 = vst.msk [vmem:[%s507_s3 + $0x50] sm:$0xf] %vm122_vm2, %v207_v31  ;;  %253 = vst.msk [vmem:[%s507_s3 + $0x4c] sm:$0xf] %vm122_vm2, %v200_v32 }
 0x19d   :  { %v209_v33 = vpop.permute.xlu1 %208  ;;  %v128_v34 = vpop.permute.xlu0 %127 }
 0x19e   :  { %255 = vst.msk [vmem:[%s507_s3 + $0x54] sm:$0xf] %vm122_vm2, %v209_v33  ;;  %237 = vst.msk [vmem:[%s507_s3 + $0xc] sm:$0xf] %vm122_vm2, %v128_v34 }
 0x1a1   :  { %v218_v35 = vpop.permute.xlu1 %217  ;;  %v216_v36 = vpop.permute.xlu0 %215 }
 0x1a2   :  { %257 = vst.msk [vmem:[%s507_s3 + $0x5c] sm:$0xf] %vm122_vm2, %v218_v35  ;;  %256 = vst.msk [vmem:[%s507_s3 + $0x58] sm:$0xf] %vm122_vm2, %v216_v36 }
 0x1a3   :  { %228 = vsyncpa [#allocation3], 1 }
 0x1a4   :  { %229 = vsyncpa [#allocation5], 1 }

</bundles_post_ra>
